<compile_context>
chip_gen: v7x
topology: tpu7x:2x2x1
jax: 0.10.0
libtpu: 0.0.40
codegen_flags: <defaults>
</compile_context>

<pallas_src>
import functools

import jax
import jax.numpy as jnp
from jax.experimental import pallas as pl
from jax.experimental.pallas import tpu as pltpu

# Leave headroom below v7x's 64 MiB physical VMEM (double buffers + internal
# scratch); raise toward ~96 MiB on v6e / v5e (128 MiB physical) together with
# larger T tiles if the emb kernel is still below the HBM roofline there.
_VMEM_LIMIT_BYTES = 48 * 1024 * 1024


def _round_up(x, m):
    return ((x + m - 1) // m) * m


# ----------------------------------------------------------------------------
# Kernel 1: per-utterance embedding
#   emb[n]      = mean_t(features[n]) @ W + b        (pool-before-project)
#   emb_norm[n] = emb[n] / max(||emb[n]||, 1e-8)     (bf16, for the loss kernel)
# Grid: (cdiv(N, tile_n) [parallel], cdiv(T, tile_t) [arbitrary]); the time sum
# lives in a (tile_n, D) f32 VMEM accumulator across the T axis.
# ----------------------------------------------------------------------------
def emb_kernel(x_ref, w_ref, b_ref, e_ref, en_ref, acc_ref, *, t_total, tile_t):
    k = pl.program_id(1)

    @pl.when(k == 0)
    def _():
        acc_ref[...] = jnp.zeros_like(acc_ref)

    x = x_ref[...]                                   # (tile_n, tile_t, D) bf16
    if t_total % tile_t != 0:
        # Ragged last T block: zero out-of-range frames before accumulating.
        tids = k * tile_t + jax.lax.broadcasted_iota(jnp.int32, x.shape, 1)
        x = jnp.where(tids < t_total, x, jnp.zeros_like(x))
    # f32 accumulation of the bf16 tile; no separate f32 copy is kept live.
    acc_ref[...] += jnp.sum(x, axis=1, dtype=jnp.float32)

    @pl.when(k == pl.num_programs(1) - 1)
    def _():
        xbar = acc_ref[...] * (1.0 / t_total)                    # (tile_n, D)
        e = jnp.dot(xbar.astype(jnp.bfloat16), w_ref[...],
                    preferred_element_type=jnp.float32) + b_ref[...]
        e_ref[...] = e                                           # raw embeddings
        nrm = jnp.sqrt(jnp.sum(e * e, axis=-1, keepdims=True))   # (tile_n, 1)
        en_ref[...] = (e / jnp.maximum(nrm, 1e-8)).astype(jnp.bfloat16)


def embed(features_bf16, W_bf16, b, tile_n=128, tile_t=128):
    N, T, D = features_bf16.shape
    E = W_bf16.shape[1]

    # tile_n: big enough to fill the MXU rows, multiple of 16 (bf16 sublanes).
    tile_n = max(16, min(tile_n, _round_up(N, 16)))
    # tile_t: full T when small, otherwise 128-frame chunks (masked if ragged).
    tile_t = T if T <= tile_t else tile_t
    grid_n = pl.cdiv(N, tile_n)
    grid_t = pl.cdiv(T, tile_t)
    n_pad = grid_n * tile_n                 # output rows beyond N are sliced off

    kern = functools.partial(emb_kernel, t_total=T, tile_t=tile_t)
    embs, embs_n = pl.pallas_call(
        kern,
        out_shape=(
            jax.ShapeDtypeStruct((n_pad, E), jnp.float32),
            jax.ShapeDtypeStruct((n_pad, E), jnp.bfloat16),
        ),
        grid_spec=pltpu.PrefetchScalarGridSpec(
            num_scalar_prefetch=0,
            grid=(grid_n, grid_t),
            in_specs=[
                pl.BlockSpec((tile_n, tile_t, D), lambda i, k: (i, k, 0)),
                pl.BlockSpec((D, E), lambda i, k: (0, 0)),
                pl.BlockSpec((1, E), lambda i, k: (0, 0)),
            ],
            out_specs=(
                pl.BlockSpec((tile_n, E), lambda i, k: (i, 0)),
                pl.BlockSpec((tile_n, E), lambda i, k: (i, 0)),
            ),
            scratch_shapes=[pltpu.VMEM((tile_n, D), jnp.float32)],
        ),
        compiler_params=pltpu.CompilerParams(
            dimension_semantics=("parallel", "arbitrary"),
            vmem_limit_bytes=_VMEM_LIMIT_BYTES),
    )(features_bf16, W_bf16, b)
    return embs[:N], embs_n[:N]


# ----------------------------------------------------------------------------
# Kernel 2: cosine similarity + per-query segment max + loss
#   sim[j, i]  = a_norm[j] . q_norm[i]          (embeddings already normalized)
#   max_sim[i] = max_{lo[i] <= j < hi[i]} sim[j, i]
#   loss = ( sum_{label>0}(1 - max_sim) + sum_{label<0} clamp(max_sim, 0) ) / B
# Tiled over the audio axis M with a running-max (1, B) VMEM accumulator; the
# segment mask also excludes any ragged-tile rows (row index >= M >= hi).
# ----------------------------------------------------------------------------
def loss_kernel(qt_ref, a_ref, lo_ref, hi_ref, lab_ref,
                maxsim_ref, loss_ref, acc_ref, *, inv_batch_size, tile_m):
    m = pl.program_id(0)

    @pl.when(m == 0)
    def _():
        acc_ref[...] = jnp.full_like(acc_ref, -1e30)

    # (tile_m, B): normalized dot == cosine similarity; no denominator needed.
    sims = jnp.dot(a_ref[...], qt_ref[...], preferred_element_type=jnp.float32)

    row = m * tile_m + jax.lax.broadcasted_iota(jnp.int32, sims.shape, 0)
    mask = (row >= lo_ref[...]) & (row < hi_ref[...])
    msim = jnp.where(mask, sims, -1e30)                      # finite fill
    acc_ref[...] = jnp.maximum(acc_ref[...],
                               jnp.max(msim, axis=0, keepdims=True))

    @pl.when(m == pl.num_programs(0) - 1)
    def _():
        max_sim = acc_ref[...]                               # (1, B)
        labels = lab_ref[...]                                # (1, B)
        pos_loss = jnp.sum(jnp.where(labels > 0, 1.0 - max_sim, 0.0))
        neg_loss = jnp.sum(jnp.where(labels < 0, jnp.maximum(max_sim, 0.0), 0.0))
        maxsim_ref[...] = max_sim
        loss_ref[...] = jnp.full((1, 1), (pos_loss + neg_loss) * inv_batch_size,
                                 jnp.float32)


def similarity_loss(query_norm, audio_norm, prefix_sums, labels, batch_size,
                    tile_m=512):
    B, E = query_norm.shape
    M = audio_norm.shape[0]
    tile_m = max(16, min(tile_m, _round_up(M, 16)))
    grid_m = pl.cdiv(M, tile_m)

    q_t = query_norm.T                                  # (E, B) bf16 -- tiny
    lo = prefix_sums[:-1].astype(jnp.int32).reshape(1, B)
    hi = prefix_sums[1:].astype(jnp.int32).reshape(1, B)
    lab = labels.astype(jnp.float32).reshape(1, B)

    kern = functools.partial(loss_kernel, inv_batch_size=1.0 / batch_size,
                             tile_m=tile_m)
    max_sims, loss = pl.pallas_call(
        kern,
        out_shape=(
            jax.ShapeDtypeStruct((1, B), jnp.float32),
            jax.ShapeDtypeStruct((1, 1), jnp.float32),
        ),
        grid_spec=pltpu.PrefetchScalarGridSpec(
            num_scalar_prefetch=0,
            grid=(grid_m,),
            in_specs=[
                pl.BlockSpec((E, B), lambda m: (0, 0)),        # resident
                pl.BlockSpec((tile_m, E), lambda m: (m, 0)),   # pipelined over M
                pl.BlockSpec((1, B), lambda m: (0, 0)),
                pl.BlockSpec((1, B), lambda m: (0, 0)),
                pl.BlockSpec((1, B), lambda m: (0, 0)),
            ],
            out_specs=(
                pl.BlockSpec((1, B), lambda m: (0, 0)),
                pl.BlockSpec((1, 1), lambda m: (0, 0)),
            ),
            scratch_shapes=[pltpu.VMEM((1, B), jnp.float32)],
        ),
        compiler_params=pltpu.CompilerParams(
            dimension_semantics=("arbitrary",),
            vmem_limit_bytes=_VMEM_LIMIT_BYTES),
    )(q_t, audio_norm, lo, hi, lab)
    return max_sims[0, :], loss[0, 0]


# ----------------------------------------------------------------------------
# DownstreamExpert.forward (train/valid branch) on top of the two kernels
# ----------------------------------------------------------------------------
def downstream_expert_forward(features, prefix_sums, labels, W, b, batch_size):
    embs, embs_n = embed(features.astype(jnp.bfloat16),
                         W.astype(jnp.bfloat16), b)
    query_norm = embs_n[:batch_size]
    audio_norm = embs_n[batch_size:]
    max_sims, loss = similarity_loss(query_norm, audio_norm,
                                     prefix_sums, labels, batch_size)
    return loss, max_sims, embs


# ----------------------------------------------------------------------------
# Pure-JAX reference (intended numerics: bf16 matmul operands, f32 accum)
# ----------------------------------------------------------------------------
def reference_forward(features, prefix_sums, labels, W, b, batch_size):
    fb = features.astype(jnp.bfloat16).astype(jnp.float32)
    xbar = jnp.mean(fb, axis=1)                                    # (N, D)
    embs = jnp.dot(xbar.astype(jnp.bfloat16), W.astype(jnp.bfloat16),
                   preferred_element_type=jnp.float32) + b         # (N, E)
    q = embs[:batch_size]
    a = embs[batch_size:]
    qn = jnp.sqrt(jnp.sum(q * q, axis=-1, keepdims=True))
    an = jnp.sqrt(jnp.sum(a * a, axis=-1, keepdims=True))
    dots = jnp.dot(q.astype(jnp.bfloat16), a.T.astype(jnp.bfloat16),
                   preferred_element_type=jnp.float32)
    sim = dots / jnp.maximum(qn * an.T, 1e-8)
    max_sims = []
    for i in range(batch_size):
        lo, hi = int(prefix_sums[i]), int(prefix_sums[i + 1])
        max_sims.append(jnp.max(sim[i, lo:hi]))
    max_sims = jnp.stack(max_sims)
    pos_loss = jnp.sum(jnp.where(labels > 0, 1.0 - max_sims, 0.0))
    neg_loss = jnp.sum(jnp.where(labels < 0, jnp.maximum(max_sims, 0.0), 0.0))
    loss = (pos_loss + neg_loss) / batch_size
    return loss, max_sims, embs


if __name__ == "__main__":
    key = jax.random.PRNGKey(0)

    # Small shapes implied by the forward:
    B = 2                                                  # datarc['batch_size']
    T = 16                                                 # frames per utterance
    D = 32                                                 # upstream_dim
    E = 128                                                # embedding dim
    prefix_sums = jnp.array([0, 3, 7], dtype=jnp.int32)    # audio segments / query
    M = int(prefix_sums[-1])                               # audio utterances
    N = B + M                                              # stacked utterances

    k1, k2, k3 = jax.random.split(key, 3)
    features = jax.random.normal(k1, (N, T, D), dtype=jnp.float32)
    W = jax.random.normal(k2, (D, E), dtype=jnp.float32) * 0.1
    b = jax.random.normal(k3, (1, E), dtype=jnp.float32) * 0.01
    labels = jnp.array([1, -1], dtype=jnp.int32)           # one pos, one neg pair

    loss, max_sims, embs = downstream_expert_forward(
        features, prefix_sums, labels, W, b, B)
    jax.block_until_ready((loss, max_sims, embs))

    ref_loss, ref_max, ref_embs = reference_forward(
        features, prefix_sums, labels, W, b, B)

    assert embs.shape == (N, E) and max_sims.shape == (B,)
    assert float(jnp.max(jnp.abs(embs - ref_embs))) < 2e-3
    assert float(jnp.max(jnp.abs(max_sims - ref_max))) < 5e-3
    assert abs(float(loss) - float(ref_loss)) < 5e-3

    print("KERNEL_OK")
</pallas_src>

<mosaic_0001>
module attributes {stable_mosaic.version = 11 : i64} {
  func.func @emb_kernel(%arg0: i32, %arg1: i32, %arg2: memref<16x16x32xbf16, #tpu.memory_space<vmem>>, %arg3: memref<32x128xbf16, #tpu.memory_space<vmem>>, %arg4: memref<1x128xf32, #tpu.memory_space<vmem>>, %arg5: memref<16x128xf32, #tpu.memory_space<vmem>>, %arg6: memref<16x128xbf16, #tpu.memory_space<vmem>>, %arg7: memref<16x32xf32, #tpu.memory_space<vmem>>) attributes {dimension_semantics = [#tpu.dimension_semantics<parallel>, #tpu.dimension_semantics<arbitrary>], iteration_bounds = array<i64: 1, 1>, scalar_prefetch = 0 : i64, scratch_operands = 1 : i64, tpu.core_type = #tpu.core_type<tc>, window_params = [{transform_indices = @transform_0, window_bounds = array<i64: 16, 16, 32>}, {pipeline_mode = #tpu.pipeline_mode<synchronous>, transform_indices = @transform_1, window_bounds = array<i64: 32, 128>}, {pipeline_mode = #tpu.pipeline_mode<synchronous>, transform_indices = @transform_2, window_bounds = array<i64: 1, 128>}, {transform_indices = @transform_3, window_bounds = array<i64: 16, 128>}, {transform_indices = @transform_4, window_bounds = array<i64: 16, 128>}]} {
    %c0_i32 = arith.constant 0 : i32
    %0 = arith.cmpi eq, %arg1, %c0_i32 : i32
    %1 = arith.extui %0 : i1 to i32
    %c0_i32_0 = arith.constant 0 : i32
    %2 = arith.cmpi ne, %1, %c0_i32_0 : i32
    scf.if %2 {
      %cst_9 = arith.constant 0.000000e+00 : f32
      %12 = vector.broadcast %cst_9 : f32 to vector<16x32xf32>
      %c0_10 = arith.constant 0 : index
      %c0_11 = arith.constant 0 : index
      %13 = vector.load %arg7[%c0_10, %c0_11] : memref<16x32xf32, #tpu.memory_space<vmem>>, vector<16x32xf32>
      tpu.vector_store %arg7[%c0_10, %c0_11], %12 {strides = array<i32>} : memref<16x32xf32, #tpu.memory_space<vmem>>, vector<16x32xf32>,
    } else {
    }
    %c0 = arith.constant 0 : index
    %c0_1 = arith.constant 0 : index
    %c0_2 = arith.constant 0 : index
    %3 = vector.load %arg2[%c0, %c0_1, %c0_2] : memref<16x16x32xbf16, #tpu.memory_space<vmem>>, vector<16x16x32xbf16>
    %c0_3 = arith.constant 0 : index
    %c0_4 = arith.constant 0 : index
    %4 = vector.load %arg7[%c0_3, %c0_4] : memref<16x32xf32, #tpu.memory_space<vmem>>, vector<16x32xf32>
    %5 = arith.extf %3 : vector<16x16x32xbf16> to vector<16x16x32xf32>
    %cst = arith.constant dense<0.000000e+00> : vector<16x32xf32>
    %6 = vector.multi_reduction <add>, %5, %cst [1] : vector<16x16x32xf32> to vector<16x32xf32>
    %7 = arith.addf %4, %6 : vector<16x32xf32>
    %c0_5 = arith.constant 0 : index
    %c0_6 = arith.constant 0 : index
    %8 = vector.load %arg7[%c0_5, %c0_6] : memref<16x32xf32, #tpu.memory_space<vmem>>, vector<16x32xf32>
    tpu.vector_store %arg7[%c0_5, %c0_6], %7 {strides = array<i32>} : memref<16x32xf32, #tpu.memory_space<vmem>>, vector<16x32xf32>,
    %c0_i32_7 = arith.constant 0 : i32
    %9 = arith.cmpi eq, %arg1, %c0_i32_7 : i32
    %10 = arith.extui %9 : i1 to i32
    %c0_i32_8 = arith.constant 0 : i32
    %11 = arith.cmpi ne, %10, %c0_i32_8 : i32
    scf.if %11 {
      %c0_9 = arith.constant 0 : index
      %c0_10 = arith.constant 0 : index
      %12 = vector.load %arg7[%c0_9, %c0_10] : memref<16x32xf32, #tpu.memory_space<vmem>>, vector<16x32xf32>
      %cst_11 = arith.constant 6.250000e-02 : f32
      %13 = vector.broadcast %cst_11 : f32 to vector<16x32xf32>
      %14 = arith.mulf %12, %13 : vector<16x32xf32>
      %15 = arith.truncf %14 : vector<16x32xf32> to vector<16x32xbf16>
      %c0_12 = arith.constant 0 : index
      %c0_13 = arith.constant 0 : index
      %16 = vector.load %arg3[%c0_12, %c0_13] : memref<32x128xbf16, #tpu.memory_space<vmem>>, vector<32x128xbf16>
      %cst_14 = arith.constant dense<0.000000e+00> : vector<16x128xf32>
      %17 = tpu.matmul %15, %16, %cst_14 {dimension_numbers = #tpu.dot_dimension_numbers<[1], [0], [0], [1], [0, 0, 1, 1], [], []>} : vector<16x32xbf16>, vector<32x128xbf16>, vector<16x128xf32> -> vector<16x128xf32>
      %c0_15 = arith.constant 0 : index
      %c0_16 = arith.constant 0 : index
      %18 = vector.load %arg4[%c0_15, %c0_16] : memref<1x128xf32, #tpu.memory_space<vmem>>, vector<1x128xf32>
      %19 = vector.broadcast %18 : vector<1x128xf32> to vector<16x128xf32>
      %20 = arith.addf %17, %19 : vector<16x128xf32>
      %c0_17 = arith.constant 0 : index
      %c0_18 = arith.constant 0 : index
      %21 = vector.load %arg5[%c0_17, %c0_18] : memref<16x128xf32, #tpu.memory_space<vmem>>, vector<16x128xf32>
      tpu.vector_store %arg5[%c0_17, %c0_18], %20 {strides = array<i32>} : memref<16x128xf32, #tpu.memory_space<vmem>>, vector<16x128xf32>,
      %22 = arith.mulf %20, %20 : vector<16x128xf32>
      %cst_19 = arith.constant dense<0.000000e+00> : vector<16xf32>
      %23 = vector.multi_reduction <add>, %22, %cst_19 [1] : vector<16x128xf32> to vector<16xf32>
      %24 = vector.shape_cast %23 : vector<16xf32> to vector<16x1xf32>
      %25 = math.sqrt %24 : vector<16x1xf32>
      %cst_20 = arith.constant 9.99999993E-9 : f32
      %26 = vector.broadcast %cst_20 : f32 to vector<16x1xf32>
      %27 = arith.maximumf %25, %26 : vector<16x1xf32>
      %28 = vector.broadcast %27 : vector<16x1xf32> to vector<16x128xf32>
      %29 = arith.divf %20, %28 : vector<16x128xf32>
      %30 = arith.truncf %29 : vector<16x128xf32> to vector<16x128xbf16>
      %c0_21 = arith.constant 0 : index
      %c0_22 = arith.constant 0 : index
      %31 = vector.load %arg6[%c0_21, %c0_22] : memref<16x128xbf16, #tpu.memory_space<vmem>>, vector<16x128xbf16>
      tpu.vector_store %arg6[%c0_21, %c0_22], %30 {strides = array<i32>} : memref<16x128xbf16, #tpu.memory_space<vmem>>, vector<16x128xbf16>,
    } else {
    }
    return
  }
  func.func @transform_0(%arg0: i32, %arg1: i32) -> (i32, i32, i32) {
    %c0_i32 = arith.constant 0 : i32
    %c0_i32_0 = arith.constant 0 : i32
    return %arg0, %arg1, %c0_i32 : i32, i32, i32
  }
  func.func @transform_1(%arg0: i32, %arg1: i32) -> (i32, i32) {
    %c0_i32 = arith.constant 0 : i32
    %c0_i32_0 = arith.constant 0 : i32
    %c0_i32_1 = arith.constant 0 : i32
    return %c0_i32, %c0_i32_0 : i32, i32
  }
  func.func @transform_2(%arg0: i32, %arg1: i32) -> (i32, i32) {
    %c0_i32 = arith.constant 0 : i32
    %c0_i32_0 = arith.constant 0 : i32
    %c0_i32_1 = arith.constant 0 : i32
    return %c0_i32, %c0_i32_0 : i32, i32
  }
  func.func @transform_3(%arg0: i32, %arg1: i32) -> (i32, i32) {
    %c0_i32 = arith.constant 0 : i32
    %c0_i32_0 = arith.constant 0 : i32
    return %arg0, %c0_i32 : i32, i32
  }
  func.func @transform_4(%arg0: i32, %arg1: i32) -> (i32, i32) {
    %c0_i32 = arith.constant 0 : i32
    %c0_i32_0 = arith.constant 0 : i32
    return %arg0, %c0_i32 : i32, i32
  }
}

</mosaic_0001>

<bundles_post_ra>
// kernel: tpu_custom_call.1
= control target key start
LH: loop header
LB: loop body
LE: loop exit
PB: predicated region body
PF: predicated region fallthrough
CT: control target
= control target key end

     0   :  { %10 = vsyncpa [#allocation4], 0  ;;  %s919_s0 = inlined_call_operand.hbm [shape: bf16[9,16,32], index: 0, kind: input, shape index: {}]   ;;  %s920_s1 = inlined_call_operand.hbm [shape: bf16[32,128], index: 1, kind: input, shape index: {}]   ;;  %s921_s2 = inlined_call_operand.vmem [shape: f32[1,128], index: 2, kind: input, shape index: {}]   ;;  %s922_s3 = inlined_call_operand.hbm [shape: f32[16,128], index: 3, kind: output, shape index: {0}]   ;;  %s923_s4 = inlined_call_operand.hbm [shape: bf16[16,128], index: 4, kind: output, shape index: {1}]  }
   0x1   :  { %11 = vsyncpa [#allocation7], 0 }
   0x2   :  { %12 = vsyncpa [#allocation5], 0 }
   0x3   :  { %13 = vsyncpa [#allocation10], 0 }
   0x4   :  { %18 = vsyncadd [#allocation4], 896  ;;  %s674_s15 = smov [#allocation3]   ;;  %s578_s19 = scalar_lea.hbm %s919_s0, 1152 }
   0x5   :  { %s19_s16 = sshll.u32 %s674_s15, 4  ;;  %p579_p0 = scmp.ne.s32.totalorder %s919_s0, %s578_s19  ;;  %s20_s16 = int_to_ptr.vmem [resolvable:$true] %s19_s16 }
   0x6   :  { %p582_p1 = scmp.lt.u32.totalorder %s578_s19, %s919_s0 }
   0x8   :  { %p584_p2 = pnand %p582_p1, %p579_p0 }
   0xa   :  { %587 = shalt.err (!%p584_p2)
}
   0xb   :  { %s588_s24 = scalar_lea.vmem %s20_s16, 1152  ;;  %s592_s25 = scalar_lea.vmem %s20_s16, 2048 }
   0xc   :  { %p589_p3 = scmp.ne.s32.totalorder %s20_s16, %s588_s24  ;;  %p593_p4 = scmp.lt.s32.totalorder %s20_s16, %s20_s16 }
   0xd   :  { %p594_p5 = scmp.lt.s32.totalorder %s592_s25, %s588_s24 }
   0xf   :  { %p595_p6 = por %p594_p5, %p593_p4 }
  0x11   :  { %p596_p7 = pnand %p595_p6, %p589_p3 }
  0x13   :  { %599 = shalt.err (!%p596_p7)
}
  0x14   :  { %s675_s26 = smov 64   ;;  %s676_s27 = smov 4  }
  0x15   :  { %25 = dma.hbm_to_vmem [thread:$0]  %s919_s0, 1152, %s20_s16, [#allocation4], %s675_s26, %s675_s26, %s676_s27  }
  0x16   :  { %s677_s30 = smov [#allocation6]   ;;  %s600_s8 = scalar_lea.hbm %s920_s1, 256 }
  0x17   :  { %s31_s5 = sshll.u32 %s677_s30, 4  ;;  %p601_p8 = scmp.ne.s32.totalorder %s920_s1, %s600_s8  ;;  %s32_s5 = int_to_ptr.vmem [resolvable:$true] %s31_s5 }
  0x18   :  { %p604_p9 = scmp.lt.u32.totalorder %s600_s8, %s920_s1 }
  0x1a   :  { %p606_p10 = pnand %p604_p9, %p601_p8 }
  0x1c   :  { %609 = shalt.err (!%p606_p10)
}
  0x1d   :  { %s610_s13 = scalar_lea.vmem %s32_s5, 256  ;;  %p615_p12 = scmp.lt.s32.totalorder %s32_s5, %s32_s5 }
  0x1e   :  { %p611_p11 = scmp.ne.s32.totalorder %s32_s5, %s610_s13  ;;  %p616_p13 = scmp.lt.s32.totalorder %s610_s13, %s610_s13 }
  0x20   :  { %p617_p0 = por %p616_p13, %p615_p12 }
  0x22   :  { %p618_p1 = pnand %p617_p0, %p611_p11 }
  0x24   :  { %621 = shalt.err (!%p618_p1)
}
  0x25   :  { %37 = dma.hbm_to_vmem [thread:$0]  %s920_s1, 256, %s32_s5, [#allocation7], %s675_s26, %s675_s26, %s676_s27  }
  0x26   :  { %666 = dma.done.wait [#allocation4], 2048  }
  0x27   :  { %667 = vsyncadd [#allocation4], 4294965248 }
  0x28   :  { %668 = dma.done.wait [#allocation7], 256  }
  0x29   :  { %669 = vsyncadd [#allocation7], 4294967040  ;;  %vm51_vm0 = vcmask 261120   ;;  %v678_v0 = vmov 0.0   ;;  %vm679_vm1 = vmmov 0   ;;  %v464_v1 = vld [vmem:[#allocation3] sm:$0xff]  }
  0x2a   :  { %52 = vst.msk [vmem:[#allocation2] sm:$0xff] %vm51_vm0, %v678_v0  ;;  %53 = vst.msk [vmem:[#allocation2 + $0x8] sm:$0xff] %vm51_vm0, %v678_v0  ;;  %550 = vmatprep.subr.bf16.mxu0 %v678_v0  ;;  %554 = vmatprep.mubr.msk.bf16.mxu0 %vm679_vm1, %v678_v0  ;;  %v532_v2 = vld [vmem:[#allocation3 + $0x8] sm:$0xff]   ;;  %v533_v3 = vld [vmem:[#allocation3 + $0x10] sm:$0xff]   ;;  %v465_v4 = vunpack.c.l.bf16 %v464_v1  ;;  %v466_v5 = vunpack.c.h.bf16 %v464_v1  ;;  %vm281_vm2 = vcmask 1041409   ;;  %vm283_vm3 = vcmask 1042434  }
  0x2b   :  { %v469_v6 = vunpack.c.l.bf16 %v532_v2  ;;  %v470_v7 = vunpack.c.h.bf16 %v532_v2  ;;  %v534_v8 = vld [vmem:[#allocation3 + $0x18] sm:$0xff]   ;;  %v535_v9 = vld [vmem:[#allocation3 + $0x20] sm:$0xff]   ;;  %v741_v10 = vld [vmem:[#allocation3 + $0x28] sm:$0xff]   ;;  %v473_v11 = vunpack.c.l.bf16 %v533_v3  ;;  %v474_v12 = vunpack.c.h.bf16 %v533_v3  ;;  %s680_s16 = smov [#allocation8]  }
  0x2c   :  { %v477_v13 = vunpack.c.l.bf16 %v534_v8  ;;  %v478_v14 = vunpack.c.h.bf16 %v534_v8  ;;  %v743_v15 = vld [vmem:[#allocation3 + $0x30] sm:$0xff]   ;;  %v745_v16 = vld [vmem:[#allocation3 + $0x38] sm:$0xff]   ;;  %v747_v17 = vld [vmem:[#allocation3 + $0x40] sm:$0xff]   ;;  %v481_v18 = vunpack.c.l.bf16 %v535_v9  ;;  %v482_v19 = vunpack.c.h.bf16 %v535_v9  ;;  %s426_s17 = sshll.u32 %s680_s16, 4  ;;  %s427_s17 = int_to_ptr.vmem [resolvable:$true] %s426_s17 }
  0x2d   :  { %v485_v20 = vunpack.c.l.bf16 %v741_v10  ;;  %v486_v21 = vunpack.c.h.bf16 %v741_v10  ;;  %v751_v22 = vld [vmem:[#allocation3 + $0x48] sm:$0xff]   ;;  %v753_v23 = vld [vmem:[#allocation3 + $0x50] sm:$0xff]   ;;  %v755_v24 = vld [vmem:[#allocation3 + $0x58] sm:$0xff]   ;;  %v489_v25 = vunpack.c.l.bf16 %v743_v15  ;;  %v490_v26 = vunpack.c.h.bf16 %v743_v15  ;;  %s622_s18 = scalar_lea.vmem %s427_s17, 256  ;;  %p627_p3 = scmp.lt.s32.totalorder %s427_s17, %s427_s17 }
  0x2e   :  { %v493_v27 = vunpack.c.l.bf16 %v745_v16  ;;  %v494_v28 = vunpack.c.h.bf16 %v745_v16  ;;  %v761_v29 = vld [vmem:[#allocation3 + $0x60] sm:$0xff]   ;;  %v763_v30 = vld [vmem:[#allocation3 + $0x68] sm:$0xff]   ;;  %v497_v31 = vunpack.c.l.bf16 %v747_v17  ;;  %v498_v32 = vunpack.c.h.bf16 %v747_v17  ;;  %v769_v35 = vld [vmem:[#allocation3 + $0x70] sm:$0xff]   ;;  %p623_p2 = scmp.ne.s32.totalorder %s427_s17, %s622_s18  ;;  %p628_p4 = scmp.lt.s32.totalorder %s622_s18, %s622_s18 }
  0x2f   :  { %v501_v33 = vunpack.c.l.bf16 %v751_v22  ;;  %v502_v34 = vunpack.c.h.bf16 %v751_v22  ;;  %v771_v36 = vld [vmem:[#allocation3 + $0x78] sm:$0xff]   ;;  %v505_v37 = vunpack.c.l.bf16 %v753_v23  ;;  %v506_v38 = vunpack.c.h.bf16 %v753_v23  ;;  %v568_v41 = vld [vmem:[#allocation6] sm:$0xff]   ;;  %v569_v50 = vld [vmem:[#allocation6 + $0x8] sm:$0xff]  }
  0x30   :  { %v509_v39 = vunpack.c.l.bf16 %v755_v24  ;;  %v510_v40 = vunpack.c.h.bf16 %v755_v24  ;;  %v513_v42 = vunpack.c.l.bf16 %v761_v29  ;;  %v514_v43 = vunpack.c.h.bf16 %v761_v29  ;;  %551 = vmatpush3.bf16.msra.mxu0 %v568_v41  ;;  %p629_p5 = por %p628_p4, %p627_p3 }
  0x31   :  { %v517_v44 = vunpack.c.l.bf16 %v763_v30  ;;  %v518_v45 = vunpack.c.h.bf16 %v763_v30  ;;  %v521_v46 = vunpack.c.l.bf16 %v769_v35  ;;  %v522_v47 = vunpack.c.h.bf16 %v769_v35  ;;  %552 = vmatprep.subr.bf16.mxu0 %v678_v0 }
  0x32   :  { %v525_v48 = vunpack.c.l.bf16 %v771_v36  ;;  %v526_v49 = vunpack.c.h.bf16 %v771_v36  ;;  %v121_v51 = vsel %vm51_vm0, %v465_v4, 0.0  ;;  %v122_v52 = vsel %vm51_vm0, %v466_v5, 0.0  ;;  %p630_p6 = pnand %p629_p5, %p623_p2 }
  0x33   :  { %v130_v53 = vsel %vm51_vm0, %v469_v6, 0.0  ;;  %v131_v54 = vsel %vm51_vm0, %v470_v7, 0.0  ;;  %v123_v55 = vadd.f32 %v122_v52, %v121_v51  ;;  %v139_v57 = vsel %vm51_vm0, %v473_v11, 0.0 }
  0x34   :  { %v132_v56 = vadd.f32 %v131_v54, %v130_v53  ;;  %v140_v58 = vsel %vm51_vm0, %v474_v12, 0.0  ;;  %v148_v60 = vsel %vm51_vm0, %v477_v13, 0.0  ;;  %v149_v61 = vsel %vm51_vm0, %v478_v14, 0.0  ;;  %553 = vmatpush3.bf16.msra.mxu0 %v569_v50 }
  0x35   :  { %v141_v59 = vadd.f32 %v140_v58, %v139_v57  ;;  %v157_v62 = vsel %vm51_vm0, %v481_v18, 0.0  ;;  %v124_v63 = vrot.slane %v123_v55, 4  ;;  %v150_v2 = vadd.f32 %v149_v61, %v148_v60 }
  0x36   :  { %v133_v1 = vrot.slane %v132_v56, 4  ;;  %v158_v3 = vsel %vm51_vm0, %v482_v19, 0.0  ;;  %v166_v5 = vsel %vm51_vm0, %v485_v20, 0.0  ;;  %v167_v6 = vsel %vm51_vm0, %v486_v21, 0.0 }
  0x37   :  { %v142_v0 = vrot.slane %v141_v59, 4  ;;  %v159_v4 = vadd.f32 %v158_v3, %v157_v62  ;;  %v125_v7 = vadd.f32 %v124_v63, %v123_v55  ;;  %v151_v9 = vrot.slane %v150_v2, 4 }
  0x38   :  { %v134_v8 = vadd.f32 %v133_v1, %v132_v56  ;;  %v168_v10 = vadd.f32 %v167_v6, %v166_v5  ;;  %v175_v13 = vsel %vm51_vm0, %v489_v25, 0.0  ;;  %v176_v14 = vsel %vm51_vm0, %v490_v26, 0.0 }
  0x39   :  { %v143_v11 = vadd.f32 %v142_v0, %v141_v59  ;;  %v160_v12 = vrot.slane %v159_v4, 4  ;;  %v126_v15 = vrot.slane %v125_v7, 2  ;;  %v152_v19 = vadd.f32 %v151_v9, %v150_v2 }
  0x3a   :  { %v135_v18 = vrot.slane %v134_v8, 2  ;;  %v169_v41 = vrot.slane %v168_v10, 4  ;;  %v177_v52 = vadd.f32 %v176_v14, %v175_v13  ;;  %v184_v20 = vsel %vm51_vm0, %v493_v27, 0.0 }
  0x3b   :  { %v144_v50 = vrot.slane %v143_v11, 2  ;;  %v161_v51 = vadd.f32 %v160_v12, %v159_v4  ;;  %v127_v21 = vadd.f32 %v126_v15, %v125_v7  ;;  %v153_v54 = vrot.slane %v152_v19, 2 }
  0x3c   :  { %v136_v53 = vadd.f32 %v135_v18, %v134_v8  ;;  %v170_v55 = vadd.f32 %v169_v41, %v168_v10  ;;  %v178_v58 = vrot.slane %v177_v52, 4  ;;  %v185_v25 = vsel %vm51_vm0, %v494_v28, 0.0 }
  0x3d   :  { %v145_v56 = vadd.f32 %v144_v50, %v143_v11  ;;  %v162_v57 = vrot.slane %v161_v51, 2  ;;  %v128_v26 = vrot.slane %v127_v21, 1  ;;  %v154_v60 = vadd.f32 %v153_v54, %v152_v19 }
  0x3e   :  { %v137_v59 = vrot.slane %v136_v53, 1  ;;  %v171_v61 = vrot.slane %v170_v55, 2  ;;  %v179_v1 = vadd.f32 %v178_v58, %v177_v52  ;;  %v186_v2 = vadd.f32 %v185_v25, %v184_v20 }
  0x3f   :  { %v146_v62 = vrot.slane %v145_v56, 1  ;;  %v163_v63 = vadd.f32 %v162_v57, %v161_v51  ;;  %v803_v27 = vadd.f32 %v128_v26, %v127_v21  ;;  %v155_v0 = vrot.slane %v154_v60, 1 }
  0x40   :  { %v805_v3 = vadd.f32 %v137_v59, %v136_v53  ;;  %v172_v4 = vadd.f32 %v171_v61, %v170_v55  ;;  %v180_v16 = vrot.slane %v179_v1, 2  ;;  %v187_v7 = vrot.slane %v186_v2, 4 }
  0x41   :  { %v807_v5 = vadd.f32 %v146_v62, %v145_v56  ;;  %v164_v6 = vrot.slane %v163_v63, 1  ;;  %v809_v28 = vadd.f32 %v155_v0, %v154_v60  ;;  %v193_v9 = vsel %vm51_vm0, %v497_v31, 0.0 }
  0x42   :  { %v173_v8 = vrot.slane %v172_v4, 1  ;;  %v194_v10 = vsel %vm51_vm0, %v498_v32, 0.0  ;;  %v181_v12 = vadd.f32 %v180_v16, %v179_v1  ;;  %v188_v13 = vadd.f32 %v187_v7, %v186_v2 }
  0x43   :  { %v817_v11 = vadd.f32 %v164_v6, %v163_v63  ;;  %v195_v14 = vadd.f32 %v194_v10, %v193_v9  ;;  %v202_v18 = vsel %vm51_vm0, %v501_v33, 0.0  ;;  %v203_v19 = vsel %vm51_vm0, %v502_v34, 0.0 }
  0x44   :  { %v819_v15 = vadd.f32 %v173_v8, %v172_v4  ;;  %v211_v17 = vsel %vm51_vm0, %v505_v37, 0.0  ;;  %v182_v31 = vrot.slane %v181_v12, 1  ;;  %v189_v32 = vrot.slane %v188_v13, 2 }
  0x45   :  { %v196_v41 = vrot.slane %v195_v14, 4  ;;  %v204_v50 = vadd.f32 %v203_v19, %v202_v18  ;;  %v212_v51 = vsel %vm51_vm0, %v506_v38, 0.0  ;;  %v220_v33 = vsel %vm51_vm0, %v509_v39, 0.0 }
  0x46   :  { %v221_v22 = vsel %vm51_vm0, %v510_v40, 0.0  ;;  %v229_v34 = vsel %vm51_vm0, %v513_v42, 0.0  ;;  %v842_v37 = vadd.f32 %v182_v31, %v181_v12  ;;  %v190_v52 = vadd.f32 %v189_v32, %v188_v13 }
  0x47   :  { %v197_v20 = vadd.f32 %v196_v41, %v195_v14  ;;  %v205_v21 = vrot.slane %v204_v50, 4  ;;  %v213_v23 = vadd.f32 %v212_v51, %v211_v17  ;;  %v222_v38 = vadd.f32 %v221_v22, %v220_v33 }
  0x48   :  { %v230_v39 = vsel %vm51_vm0, %v514_v43, 0.0  ;;  %v238_v24 = vsel %vm51_vm0, %v517_v44, 0.0  ;;  %v191_v40 = vrot.slane %v190_v52, 1  ;;  %vm285_vm4 = vcmask 1043459  }
  0x49   :  { %v198_v53 = vrot.slane %v197_v20, 2  ;;  %v206_v42 = vadd.f32 %v205_v21, %v204_v50  ;;  %v231_v54 = vadd.f32 %v230_v39, %v229_v34  ;;  %v214_v55 = vrot.slane %v213_v23, 4  ;;  %v86_v21 = vld [vmem:[#allocation2] sm:$0xff] }
  0x4a   :  { %v223_v56 = vrot.slane %v222_v38, 4  ;;  %v239_v57 = vsel %vm51_vm0, %v518_v45, 0.0  ;;  %v247_v29 = vsel %vm51_vm0, %v521_v46, 0.0  ;;  %vm287_vm5 = vcmask 1044484  }
  0x4b   :  { %v192_v43 = vadd.f32 %v191_v40, %v190_v52  ;;  %v199_v58 = vadd.f32 %v198_v53, %v197_v20  ;;  %v207_v44 = vrot.slane %v206_v42, 2  ;;  %v232_v25 = vrot.slane %v231_v54, 4 }
  0x4c   :  { %vm289_vm6 = vcmask 1045509   ;;  %v215_v26 = vadd.f32 %v214_v55, %v213_v23  ;;  %v224_v59 = vadd.f32 %v223_v56, %v222_v38  ;;  %v240_v60 = vadd.f32 %v239_v57, %v238_v24 }
  0x4d   :  { %v248_v61 = vsel %vm51_vm0, %v522_v47, 0.0  ;;  %vm291_vm7 = vcmask 1046534   ;;  %v200_v30 = vrot.slane %v199_v58, 1  ;;  %v208_v45 = vadd.f32 %v207_v44, %v206_v42 }
  0x4e   :  { %v233_v62 = vadd.f32 %v232_v25, %v231_v54  ;;  %v249_v63 = vadd.f32 %v248_v61, %v247_v29  ;;  %vm293_vm8 = vcmask 1047559   ;;  %v216_v46 = vrot.slane %v215_v26, 2  ;;  %v455_v61 = vld [vmem:[%s921_s2] ss:$0 sm:$0xff] }
  0x4f   :  { %v225_v1 = vrot.slane %v224_v59, 2  ;;  %v241_v2 = vrot.slane %v240_v60, 4  ;;  %v256_v0 = vsel %vm51_vm0, %v525_v48, 0.0  ;;  %v201_v4 = vadd.f32 %v200_v30, %v199_v58 }
  0x50   :  { %v209_v6 = vrot.slane %v208_v45, 1  ;;  %v234_v16 = vrot.slane %v233_v62, 2  ;;  %v250_v7 = vrot.slane %v249_v63, 4  ;;  %v217_v35 = vadd.f32 %v216_v46, %v215_v26 }
  0x51   :  { %v226_v8 = vadd.f32 %v225_v1, %v224_v59  ;;  %v242_v47 = vadd.f32 %v241_v2, %v240_v60  ;;  %v257_v9 = vsel %vm51_vm0, %v526_v49, 0.0  ;;  %v282_v48 = vsel %vm281_vm2, %v805_v3, %v803_v27 }
  0x52   :  { %v210_v10 = vadd.f32 %v209_v6, %v208_v45  ;;  %v235_v12 = vadd.f32 %v234_v16, %v233_v62  ;;  %v251_v13 = vadd.f32 %v250_v7, %v249_v63  ;;  %v258_v14 = vadd.f32 %v257_v9, %v256_v0 }
  0x53   :  { %v218_v18 = vrot.slane %v217_v35, 1  ;;  %v227_v19 = vrot.slane %v226_v8, 1  ;;  %v243_v17 = vrot.slane %v242_v47, 2  ;;  %v284_v50 = vsel %vm283_vm3, %v807_v5, %v282_v48 }
  0x54   :  { %v236_v31 = vrot.slane %v235_v12, 1  ;;  %v252_v32 = vrot.slane %v251_v13, 2  ;;  %v259_v41 = vrot.slane %v258_v14, 4  ;;  %v286_v33 = vsel %vm285_vm4, %v809_v28, %v284_v50 }
  0x55   :  { %v219_v36 = vadd.f32 %v218_v18, %v217_v35  ;;  %v228_v51 = vadd.f32 %v227_v19, %v226_v8  ;;  %v244_v49 = vadd.f32 %v243_v17, %v242_v47  ;;  %v288_v20 = vsel %vm287_vm5, %v817_v11, %v286_v33 }
  0x56   :  { %v237_v22 = vadd.f32 %v236_v31, %v235_v12  ;;  %v253_v34 = vadd.f32 %v252_v32, %v251_v13  ;;  %v260_v52 = vadd.f32 %v259_v41, %v258_v14  ;;  %v290_v3 = vsel %vm289_vm6, %v819_v15, %v288_v20 }
  0x57   :  { %v245_v27 = vrot.slane %v244_v49, 1  ;;  %v295_v23 = vsel %vm281_vm2, %v210_v10, %v201_v4  ;;  %v292_v39 = vsel %vm291_vm7, %v842_v37, %v290_v3  ;;  %v87_v37 = vld [vmem:[#allocation2 + $0x8] sm:$0xff] }
  0x58   :  { %v254_v5 = vrot.slane %v253_v34, 1  ;;  %v261_v38 = vrot.slane %v260_v52, 2  ;;  %v296_v28 = vsel %vm283_vm3, %v219_v36, %v295_v23  ;;  %v294_v40 = vsel %vm293_vm8, %v192_v43, %v292_v39 }
  0x59   :  { %v246_v24 = vadd.f32 %v245_v27, %v244_v49  ;;  %v297_v53 = vsel %vm285_vm4, %v228_v51, %v296_v28  ;;  %v304_v55 = vadd.f32 %v294_v40, %v86_v21 }
  0x5a   :  { %v255_v11 = vadd.f32 %v254_v5, %v253_v34  ;;  %v262_v42 = vadd.f32 %v261_v38, %v260_v52  ;;  %v298_v54 = vsel %vm287_vm5, %v237_v22, %v297_v53 }
  0x5b   :  { %v299_v15 = vsel %vm289_vm6, %v246_v24, %v298_v54  ;;  %306 = vst.msk [vmem:[#allocation2] sm:$0xff] %vm51_vm0, %v304_v55 }
  0x5c   :  { %v263_v56 = vrot.slane %v262_v42, 1  ;;  %v300_v57 = vsel %vm291_vm7, %v255_v11, %v299_v15 }
  0x5e   :  { %v264_v29 = vadd.f32 %v263_v56, %v262_v42 }
  0x60   :  { %v301_v58 = vsel %vm293_vm8, %v264_v29, %v300_v57 }
  0x61   :  { %v305_v44 = vadd.f32 %v301_v58, %v87_v37 }
  0x62   :  { %v311_v43 = vld [vmem:[#allocation2] sm:$0xff] }
  0x63   :  { %307 = vst.msk [vmem:[#allocation2 + $0x8] sm:$0xff] %vm51_vm0, %v305_v44  ;;  %v313_v25 = vmul.f32 0.0625, %v311_v43 }
  0x6a   :  { %v312_v26 = vld [vmem:[#allocation2 + $0x8] sm:$0xff] }
  0x6b   :  { %v314_v59 = vmul.f32 0.0625, %v312_v26 }
  0x6d   :  { %v315_v60 = vpack.c.bf16 %v314_v59, %v313_v25 }
  0x6f   :  { %555 = vmatmul.mubr.msk.bf16.vlgmr.msra.gmra.mrb[0].mxu0 %vm51_vm0, %v315_v60 }
 0x142   :  { %v376_v30 = vpop.f32.mrb[0].mxu0 }
 0x143   :  { %v377_v45 = vadd.f32 %v455_v61, %v376_v30  ;;  %v556_v62 = vpop.f32.mrb[1].mxu0 }
 0x144   :  { %v379_v63 = vpop.f32.mrb[2].mxu0 }
 0x145   :  { %383 = vst [vmem:[#allocation8] sm:$0xff] %v377_v45  ;;  %v380_v46 = vadd.f32 %v455_v61, %v379_v63  ;;  %v557_v1 = vpop.f32.mrb[3].mxu0  ;;  %v385_v2 = vmul.f32 %v377_v45, %v377_v45 }
 0x147   :  { %384 = vst [vmem:[#allocation8 + $0x8] sm:$0xff] %v380_v46  ;;  %387 = vadd.xlane.f32.xlu0 %v385_v2  ;;  %v386_v0 = vmul.f32 %v380_v46, %v380_v46 }
 0x14b   :  { %389 = vadd.xlane.f32.xlu0 %v386_v0 }
 0x14c   :  { %633 = shalt.err (!%p630_p6)
}
 0x14d   :  { %s634_s20 = scalar_lea.hbm %s922_s3, 256 }
 0x14e   :  { %p635_p7 = scmp.ne.s32.totalorder %s922_s3, %s634_s20  ;;  %p638_p8 = scmp.lt.u32.totalorder %s634_s20, %s922_s3 }
 0x150   :  { %p640_p9 = pnand %p638_p8, %p635_p7 }
 0x152   :  { %643 = shalt.err (!%p640_p9)
}
 0x153   :  { %s681_s25 = smov 128   ;;  %s682_s28 = smov 8  }
 0x154   :  { %432 = dma.vmem_to_hbm [thread:$0]  %s427_s17, 256, %s922_s3, [#allocation5], %s681_s25, %s681_s25, %s682_s28  }
 0x155   :  { %s683_s3 = smov [#allocation9]  }
 0x156   :  { %s438_s5 = sshll.u32 %s683_s3, 4  ;;  %s439_s5 = int_to_ptr.vmem [resolvable:$true] %s438_s5 }
 0x157   :  { %s644_s6 = scalar_lea.vmem %s439_s5, 128  ;;  %p649_p11 = scmp.lt.s32.totalorder %s439_s5, %s439_s5 }
 0x158   :  { %p645_p10 = scmp.ne.s32.totalorder %s439_s5, %s644_s6  ;;  %p650_p12 = scmp.lt.s32.totalorder %s644_s6, %s644_s6 }
 0x15a   :  { %p651_p13 = por %p650_p12, %p649_p11 }
 0x15c   :  { %p652_p0 = pnand %p651_p13, %p645_p10 }
 0x1d4   :  { %v388_v4 = vpop.xlane.xlu0 %387 }
 0x1d5   :  { %570 = vrsqrt.f32 %v388_v4  ;;  %vm393_vm9 = vcmp.eq.f32.partialorder %v388_v4, inf  ;;  %v396_v35 = vand.u32 2147483648, %v388_v4  ;;  %vm395_vm10 = vcmp.eq.f32.partialorder %v388_v4, 0.0 }
 0x1d8   :  { %v390_v6 = vpop.xlane.xlu0 %389 }
 0x1d9   :  { %572 = vrsqrt.f32 %v390_v6  ;;  %vm400_vm11 = vcmp.eq.f32.partialorder %v390_v6, inf  ;;  %v403_v13 = vand.u32 2147483648, %v390_v6  ;;  %vm402_vm12 = vcmp.eq.f32.partialorder %v390_v6, 0.0 }
 0x1df   :  { %v571_v16 = vpop.eup %570 }
 0x1e0   :  { %v392_v7 = vmul.f32 %v571_v16, %v388_v4 }
 0x1e2   :  { %v394_v8 = vsel %vm393_vm9, %v388_v4, %v392_v7 }
 0x1e3   :  { %v573_v47 = vpop.eup %572  ;;  %v397_v9 = vsel %vm395_vm10, %v396_v35, %v394_v8 }
 0x1e4   :  { %v405_v10 = vmax.f32 %v397_v9, 1e-08  ;;  %v399_v12 = vmul.f32 %v573_v47, %v390_v6 }
 0x1e6   :  { %v401_v14 = vsel %vm400_vm11, %v390_v6, %v399_v12  ;;  %574 = vrcp.f32 %v405_v10 }
 0x1e7   :  { %v404_v18 = vsel %vm402_vm12, %v403_v13, %v401_v14 }
 0x1e8   :  { %v406_v19 = vmax.f32 %v404_v18, 1e-08 }
 0x1ea   :  { %576 = vrcp.f32 %v406_v19 }
 0x1f0   :  { %v575_v17 = vpop.eup %574 }
 0x1f1   :  { %v408_v31 = vmul.f32 %v575_v17, %v377_v45 }
 0x1f4   :  { %v577_v48 = vpop.eup %576 }
 0x1f5   :  { %v410_v32 = vmul.f32 %v577_v48, %v380_v46 }
 0x1f7   :  { %v530_v41 = vpack.c.bf16 %v410_v32, %v408_v31 }
 0x1f9   :  { %531 = vst [vmem:[#allocation9] sm:$0xff] %v530_v41  }
 0x1fa   :  { %655 = shalt.err (!%p652_p0)
}
 0x1fb   :  { %s656_s9 = scalar_lea.hbm %s923_s4, 128 }
 0x1fc   :  { %p657_p1 = scmp.ne.s32.totalorder %s923_s4, %s656_s9  ;;  %p660_p2 = scmp.lt.u32.totalorder %s656_s9, %s923_s4 }
 0x1fe   :  { %p662_p3 = pnand %p660_p2, %p657_p1 }
 0x200   :  { %665 = shalt.err (!%p662_p3)
}
 0x201   :  { %444 = dma.vmem_to_hbm [thread:$0]  %s439_s5, 128, %s923_s4, [#allocation10], %s675_s26, %s675_s26, %s676_s27  }
 0x202   :  { %670 = dma.done.wait [#allocation5], 256  }
 0x203   :  { %671 = vsyncadd [#allocation5], 4294967040 }
 0x204   :  { %672 = dma.done.wait [#allocation10], 128  }
 0x205   :  { %673 = vsyncadd [#allocation10], 4294967168 }
 0x206   :  { %451 = vsyncpa [#allocation4], 1 }
 0x207   :  { %452 = vsyncpa [#allocation7], 1 }
 0x208   :  { %453 = vsyncpa [#allocation5], 1 }
 0x209   :  { %454 = vsyncpa [#allocation10], 1 }

</bundles_post_ra>
